<compile_context>
chip_gen: v7x
topology: tpu7x:2x2x1
jax: 0.10.0
libtpu: 0.0.40
codegen_flags: <defaults>
</compile_context>

<pallas_src>
import jax
import jax.numpy as jnp
from jax.experimental import pallas as pl
from jax.experimental.pallas import tpu as pltpu


def vae_kernel(
    x_ref,              # (TM, IN)    bf16
    eps_ref,            # (TM, LAT)   f32 pre-sampled N(0,1) noise (torch.randn_like)
    w1_ref, b1_ref,     # (IN, HID) bf16, (1, HID) f32       encoder.0
    wmu_ref, bmu_ref,   # (HID, LAT) bf16, (1, LAT) f32      encoder.2 (mu columns)
    wlv_ref, blv_ref,   # (HID, LAT) bf16, (1, LAT) f32      encoder.2 (log_var columns)
    w3_ref, b3_ref,     # (LAT, HID) bf16, (1, HID) f32      decoder.0
    w4_ref, b4_ref,     # (HID, IN) bf16, (1, IN) f32        decoder.2
    xrec_ref,           # (TM, IN)  f32
    mu_ref,             # (TM, LAT) f32
    logvar_ref,         # (TM, LAT) f32
):
    x = x_ref[...]  # bf16

    # ---------------- encoder ----------------
    # bf16 MXU matmuls, f32 accumulation; elementwise path in f32 (v5e friendly).
    h1 = jnp.dot(x, w1_ref[...], preferred_element_type=jnp.float32) + b1_ref[...]
    h1 = jnp.maximum(h1, 0.0).astype(jnp.bfloat16)                       # ReLU

    # encoder.2 split into mu / log_var halves -> no in-kernel lane slice (chunk).
    mu = jnp.dot(h1, wmu_ref[...], preferred_element_type=jnp.float32) + bmu_ref[...]
    log_var = jnp.dot(h1, wlv_ref[...], preferred_element_type=jnp.float32) + blv_ref[...]

    # ---------------- reparameterize (f32) ----------------
    std = jnp.exp(0.5 * log_var)
    z = (mu + eps_ref[...] * std).astype(jnp.bfloat16)

    # ---------------- decoder ----------------
    d1 = jnp.dot(z, w3_ref[...], preferred_element_type=jnp.float32) + b3_ref[...]
    d1 = jnp.maximum(d1, 0.0).astype(jnp.bfloat16)                       # ReLU
    logits = jnp.dot(d1, w4_ref[...], preferred_element_type=jnp.float32) + b4_ref[...]
    x_recon = jax.nn.sigmoid(logits)                                     # Sigmoid

    xrec_ref[...] = x_recon.astype(xrec_ref.dtype)
    mu_ref[...] = mu.astype(mu_ref.dtype)
    logvar_ref[...] = log_var.astype(logvar_ref.dtype)


def _vmem_bytes_estimate(tile_m, input_dim, hidden_dim, latent_dim):
    """Rough double-buffered VMEM footprint for one grid step (bytes)."""
    act_io = tile_m * (
        2 * input_dim          # x (bf16)
        + 4 * latent_dim       # eps (f32)
        + 4 * input_dim        # x_recon (f32)
        + 2 * 4 * latent_dim   # mu, log_var (f32)
    )
    weights = 2 * (input_dim * hidden_dim + 2 * hidden_dim * latent_dim
                   + latent_dim * hidden_dim + hidden_dim * input_dim)   # bf16
    biases = 4 * (2 * hidden_dim + 2 * latent_dim + input_dim)           # f32
    live = tile_m * 4 * (2 * hidden_dim + 2 * latent_dim + input_dim)    # intermediates
    return 2 * (act_io + weights + biases) + live                        # 2x: double-buffer


def vae_forward(x, eps, params, *, tile_m=None):
    """Run the VAE forward pass as a single Pallas call, tiled over batch."""
    B, input_dim = x.shape
    w1, b1, wmu, bmu, wlv, blv, w3, b3, w4, b4 = params
    hidden_dim = w1.shape[1]
    latent_dim = w3.shape[0]

    if tile_m is None:
        # Big tiles: tiny batches collapse to grid=(1,) (no per-step pipeline
        # overhead); large batches get >=2 grid steps (sharded across v7x TCs).
        tile_m = min(B, 512)
    assert B % tile_m == 0, "batch must be divisible by tile_m"

    grid = (B // tile_m,)

    # bf16 feeds the MXU and halves the HBM->VMEM DMA bytes; noise stays f32.
    x = x.astype(jnp.bfloat16)
    eps = eps.astype(jnp.float32)

    def row_tiled(n):
        return pl.BlockSpec((tile_m, n), lambda i: (i, 0))

    def replicated(r, c):
        # Grid-invariant weights/biases (constant block index).
        return pl.BlockSpec((r, c), lambda i: (0, 0))

    out_shapes = (
        jax.ShapeDtypeStruct((B, input_dim), jnp.float32),   # x_recon
        jax.ShapeDtypeStruct((B, latent_dim), jnp.float32),  # mu
        jax.ShapeDtypeStruct((B, latent_dim), jnp.float32),  # log_var
    )

    compiler_kwargs = dict(dimension_semantics=("parallel",))
    est = _vmem_bytes_estimate(tile_m, input_dim, hidden_dim, latent_dim)
    if est > 12 * 1024 * 1024:
        # Only raise the scoped-VMEM limit when the tile actually needs it;
        # clamp to 64 MiB so it stays valid on v7x.
        compiler_kwargs["vmem_limit_bytes"] = min(2 * est, 64 * 1024 * 1024)

    return pl.pallas_call(
        vae_kernel,
        out_shape=out_shapes,
        grid_spec=pltpu.PrefetchScalarGridSpec(
            num_scalar_prefetch=0,
            grid=grid,
            in_specs=[
                row_tiled(input_dim),                   # x
                row_tiled(latent_dim),                  # eps
                replicated(input_dim, hidden_dim),      # w1
                replicated(1, hidden_dim),              # b1
                replicated(hidden_dim, latent_dim),     # w_mu
                replicated(1, latent_dim),              # b_mu
                replicated(hidden_dim, latent_dim),     # w_logvar
                replicated(1, latent_dim),              # b_logvar
                replicated(latent_dim, hidden_dim),     # w3
                replicated(1, hidden_dim),              # b3
                replicated(hidden_dim, input_dim),      # w4
                replicated(1, input_dim),               # b4
            ],
            out_specs=[
                row_tiled(input_dim),
                row_tiled(latent_dim),
                row_tiled(latent_dim),
            ],
        ),
        compiler_params=pltpu.CompilerParams(**compiler_kwargs),
    )(x, eps, w1, b1, wmu, bmu, wlv, blv, w3, b3, w4, b4)


def init_params(key, input_dim, hidden_dim, latent_dim):
    """PyTorch-style uniform fan-in init; encoder.2 split into mu/logvar halves.

    Weights are stored bf16 (MXU + halved DMA), biases f32 (added in f32 path).
    """
    ks = jax.random.split(key, 8)

    def linear(kw, kb, fan_in, fan_out):
        bound = 1.0 / jnp.sqrt(fan_in)
        w = jax.random.uniform(kw, (fan_in, fan_out), jnp.float32, -bound, bound)
        b = jax.random.uniform(kb, (1, fan_out), jnp.float32, -bound, bound)
        return w, b

    w1, b1 = linear(ks[0], ks[1], input_dim, hidden_dim)        # encoder.0
    w2, b2 = linear(ks[2], ks[3], hidden_dim, 2 * latent_dim)   # encoder.2
    w3, b3 = linear(ks[4], ks[5], latent_dim, hidden_dim)       # decoder.0
    w4, b4 = linear(ks[6], ks[7], hidden_dim, input_dim)        # decoder.2

    # Split encoder.2 columns into the mu half and the log_var half
    # (exactly torch.chunk(h, 2, dim=-1) on the output).
    wmu, wlv = w2[:, :latent_dim], w2[:, latent_dim:]
    bmu, blv = b2[:, :latent_dim], b2[:, latent_dim:]

    bf16 = jnp.bfloat16
    return (w1.astype(bf16), b1,
            wmu.astype(bf16), bmu,
            wlv.astype(bf16), blv,
            w3.astype(bf16), b3,
            w4.astype(bf16), b4)


def vae_forward_ref(x, eps, params):
    """Pure-JAX reference with the same bf16-MXU / f32-accumulate casts."""
    w1, b1, wmu, bmu, wlv, blv, w3, b3, w4, b4 = params
    xb = x.astype(jnp.bfloat16)
    h1 = jnp.dot(xb, w1, preferred_element_type=jnp.float32) + b1
    h1 = jnp.maximum(h1, 0.0).astype(jnp.bfloat16)
    mu = jnp.dot(h1, wmu, preferred_element_type=jnp.float32) + bmu
    log_var = jnp.dot(h1, wlv, preferred_element_type=jnp.float32) + blv
    z = (mu + eps * jnp.exp(0.5 * log_var)).astype(jnp.bfloat16)
    d1 = jnp.maximum(jnp.dot(z, w3, preferred_element_type=jnp.float32) + b3,
                     0.0).astype(jnp.bfloat16)
    logits = jnp.dot(d1, w4, preferred_element_type=jnp.float32) + b4
    return jax.nn.sigmoid(logits), mu, log_var


if __name__ == "__main__":
    input_dim, hidden_dim, latent_dim = 32, 64, 16
    batch = 16

    key = jax.random.PRNGKey(0)
    k_params, k_x, k_eps = jax.random.split(key, 3)

    params = init_params(k_params, input_dim, hidden_dim, latent_dim)
    x = jax.random.uniform(k_x, (batch, input_dim), jnp.float32)
    # torch.randn_like(std) noise — sampled outside the kernel for determinism.
    # (Could also be generated in-kernel with pltpu.prng_seed/stateful_normal.)
    eps = jax.random.normal(k_eps, (batch, latent_dim), jnp.float32)

    x_recon, mu, log_var = vae_forward(x, eps, params)   # tile_m=min(B,512) -> grid=(1,)
    jax.block_until_ready((x_recon, mu, log_var))

    # Numerical check against pure-JAX reference (bf16 MXU path on both sides).
    xr_ref, mu_ref, lv_ref = vae_forward_ref(x, eps, params)
    assert jnp.allclose(x_recon, xr_ref, atol=2e-2, rtol=2e-2)
    assert jnp.allclose(mu, mu_ref, atol=2e-2, rtol=2e-2)
    assert jnp.allclose(log_var, lv_ref, atol=2e-2, rtol=2e-2)

    print("KERNEL_OK")
</pallas_src>

<mosaic_0001>
module attributes {stable_mosaic.version = 11 : i64} {
  func.func @vae_kernel(%arg0: i32, %arg1: memref<16x32xbf16, #tpu.memory_space<vmem>>, %arg2: memref<16x16xf32, #tpu.memory_space<vmem>>, %arg3: memref<32x64xbf16, #tpu.memory_space<vmem>>, %arg4: memref<1x64xf32, #tpu.memory_space<vmem>>, %arg5: memref<64x16xbf16, #tpu.memory_space<vmem>>, %arg6: memref<1x16xf32, #tpu.memory_space<vmem>>, %arg7: memref<64x16xbf16, #tpu.memory_space<vmem>>, %arg8: memref<1x16xf32, #tpu.memory_space<vmem>>, %arg9: memref<16x64xbf16, #tpu.memory_space<vmem>>, %arg10: memref<1x64xf32, #tpu.memory_space<vmem>>, %arg11: memref<64x32xbf16, #tpu.memory_space<vmem>>, %arg12: memref<1x32xf32, #tpu.memory_space<vmem>>, %arg13: memref<16x32xf32, #tpu.memory_space<vmem>>, %arg14: memref<16x16xf32, #tpu.memory_space<vmem>>, %arg15: memref<16x16xf32, #tpu.memory_space<vmem>>) attributes {dimension_semantics = [#tpu.dimension_semantics<parallel>], iteration_bounds = array<i64: 1>, scalar_prefetch = 0 : i64, scratch_operands = 0 : i64, tpu.core_type = #tpu.core_type<tc>, window_params = [{transform_indices = @transform_0, window_bounds = array<i64: 16, 32>}, {transform_indices = @transform_1, window_bounds = array<i64: 16, 16>}, {pipeline_mode = #tpu.pipeline_mode<synchronous>, transform_indices = @transform_2, window_bounds = array<i64: 32, 64>}, {pipeline_mode = #tpu.pipeline_mode<synchronous>, transform_indices = @transform_3, window_bounds = array<i64: 1, 64>}, {pipeline_mode = #tpu.pipeline_mode<synchronous>, transform_indices = @transform_4, window_bounds = array<i64: 64, 16>}, {pipeline_mode = #tpu.pipeline_mode<synchronous>, transform_indices = @transform_5, window_bounds = array<i64: 1, 16>}, {pipeline_mode = #tpu.pipeline_mode<synchronous>, transform_indices = @transform_6, window_bounds = array<i64: 64, 16>}, {pipeline_mode = #tpu.pipeline_mode<synchronous>, transform_indices = @transform_7, window_bounds = array<i64: 1, 16>}, {pipeline_mode = #tpu.pipeline_mode<synchronous>, transform_indices = @transform_8, window_bounds = array<i64: 16, 64>}, {pipeline_mode = #tpu.pipeline_mode<synchronous>, transform_indices = @transform_9, window_bounds = array<i64: 1, 64>}, {pipeline_mode = #tpu.pipeline_mode<synchronous>, transform_indices = @transform_10, window_bounds = array<i64: 64, 32>}, {pipeline_mode = #tpu.pipeline_mode<synchronous>, transform_indices = @transform_11, window_bounds = array<i64: 1, 32>}, {transform_indices = @transform_12, window_bounds = array<i64: 16, 32>}, {transform_indices = @transform_13, window_bounds = array<i64: 16, 16>}, {transform_indices = @transform_14, window_bounds = array<i64: 16, 16>}]} {
    %c0 = arith.constant 0 : index
    %c0_0 = arith.constant 0 : index
    %0 = vector.load %arg1[%c0, %c0_0] : memref<16x32xbf16, #tpu.memory_space<vmem>>, vector<16x32xbf16>
    %c0_1 = arith.constant 0 : index
    %c0_2 = arith.constant 0 : index
    %1 = vector.load %arg3[%c0_1, %c0_2] : memref<32x64xbf16, #tpu.memory_space<vmem>>, vector<32x64xbf16>
    %cst = arith.constant dense<0.000000e+00> : vector<16x64xf32>
    %2 = tpu.matmul %0, %1, %cst {dimension_numbers = #tpu.dot_dimension_numbers<[1], [0], [0], [1], [0, 0, 1, 1], [], []>} : vector<16x32xbf16>, vector<32x64xbf16>, vector<16x64xf32> -> vector<16x64xf32>
    %c0_3 = arith.constant 0 : index
    %c0_4 = arith.constant 0 : index
    %3 = vector.load %arg4[%c0_3, %c0_4] : memref<1x64xf32, #tpu.memory_space<vmem>>, vector<1x64xf32>
    %4 = vector.broadcast %3 : vector<1x64xf32> to vector<16x64xf32>
    %5 = arith.addf %2, %4 : vector<16x64xf32>
    %cst_5 = arith.constant 0.000000e+00 : f32
    %6 = vector.broadcast %cst_5 : f32 to vector<16x64xf32>
    %7 = arith.maximumf %5, %6 : vector<16x64xf32>
    %8 = arith.truncf %7 : vector<16x64xf32> to vector<16x64xbf16>
    %c0_6 = arith.constant 0 : index
    %c0_7 = arith.constant 0 : index
    %9 = vector.load %arg5[%c0_6, %c0_7] : memref<64x16xbf16, #tpu.memory_space<vmem>>, vector<64x16xbf16>
    %cst_8 = arith.constant dense<0.000000e+00> : vector<16x16xf32>
    %10 = tpu.matmul %8, %9, %cst_8 {dimension_numbers = #tpu.dot_dimension_numbers<[1], [0], [0], [1], [0, 0, 1, 1], [], []>} : vector<16x64xbf16>, vector<64x16xbf16>, vector<16x16xf32> -> vector<16x16xf32>
    %c0_9 = arith.constant 0 : index
    %c0_10 = arith.constant 0 : index
    %11 = vector.load %arg6[%c0_9, %c0_10] : memref<1x16xf32, #tpu.memory_space<vmem>>, vector<1x16xf32>
    %12 = vector.broadcast %11 : vector<1x16xf32> to vector<16x16xf32>
    %13 = arith.addf %10, %12 : vector<16x16xf32>
    %c0_11 = arith.constant 0 : index
    %c0_12 = arith.constant 0 : index
    %14 = vector.load %arg7[%c0_11, %c0_12] : memref<64x16xbf16, #tpu.memory_space<vmem>>, vector<64x16xbf16>
    %cst_13 = arith.constant dense<0.000000e+00> : vector<16x16xf32>
    %15 = tpu.matmul %8, %14, %cst_13 {dimension_numbers = #tpu.dot_dimension_numbers<[1], [0], [0], [1], [0, 0, 1, 1], [], []>} : vector<16x64xbf16>, vector<64x16xbf16>, vector<16x16xf32> -> vector<16x16xf32>
    %c0_14 = arith.constant 0 : index
    %c0_15 = arith.constant 0 : index
    %16 = vector.load %arg8[%c0_14, %c0_15] : memref<1x16xf32, #tpu.memory_space<vmem>>, vector<1x16xf32>
    %17 = vector.broadcast %16 : vector<1x16xf32> to vector<16x16xf32>
    %18 = arith.addf %15, %17 : vector<16x16xf32>
    %cst_16 = arith.constant 5.000000e-01 : f32
    %19 = vector.broadcast %cst_16 : f32 to vector<16x16xf32>
    %20 = arith.mulf %19, %18 : vector<16x16xf32>
    %21 = math.exp %20 : vector<16x16xf32>
    %c0_17 = arith.constant 0 : index
    %c0_18 = arith.constant 0 : index
    %22 = vector.load %arg2[%c0_17, %c0_18] : memref<16x16xf32, #tpu.memory_space<vmem>>, vector<16x16xf32>
    %23 = arith.mulf %22, %21 : vector<16x16xf32>
    %24 = arith.addf %13, %23 : vector<16x16xf32>
    %25 = arith.truncf %24 : vector<16x16xf32> to vector<16x16xbf16>
    %c0_19 = arith.constant 0 : index
    %c0_20 = arith.constant 0 : index
    %26 = vector.load %arg9[%c0_19, %c0_20] : memref<16x64xbf16, #tpu.memory_space<vmem>>, vector<16x64xbf16>
    %cst_21 = arith.constant dense<0.000000e+00> : vector<16x64xf32>
    %27 = tpu.matmul %25, %26, %cst_21 {dimension_numbers = #tpu.dot_dimension_numbers<[1], [0], [0], [1], [0, 0, 1, 1], [], []>} : vector<16x16xbf16>, vector<16x64xbf16>, vector<16x64xf32> -> vector<16x64xf32>
    %c0_22 = arith.constant 0 : index
    %c0_23 = arith.constant 0 : index
    %28 = vector.load %arg10[%c0_22, %c0_23] : memref<1x64xf32, #tpu.memory_space<vmem>>, vector<1x64xf32>
    %29 = vector.broadcast %28 : vector<1x64xf32> to vector<16x64xf32>
    %30 = arith.addf %27, %29 : vector<16x64xf32>
    %cst_24 = arith.constant 0.000000e+00 : f32
    %31 = vector.broadcast %cst_24 : f32 to vector<16x64xf32>
    %32 = arith.maximumf %30, %31 : vector<16x64xf32>
    %33 = arith.truncf %32 : vector<16x64xf32> to vector<16x64xbf16>
    %c0_25 = arith.constant 0 : index
    %c0_26 = arith.constant 0 : index
    %34 = vector.load %arg11[%c0_25, %c0_26] : memref<64x32xbf16, #tpu.memory_space<vmem>>, vector<64x32xbf16>
    %cst_27 = arith.constant dense<0.000000e+00> : vector<16x32xf32>
    %35 = tpu.matmul %33, %34, %cst_27 {dimension_numbers = #tpu.dot_dimension_numbers<[1], [0], [0], [1], [0, 0, 1, 1], [], []>} : vector<16x64xbf16>, vector<64x32xbf16>, vector<16x32xf32> -> vector<16x32xf32>
    %c0_28 = arith.constant 0 : index
    %c0_29 = arith.constant 0 : index
    %36 = vector.load %arg12[%c0_28, %c0_29] : memref<1x32xf32, #tpu.memory_space<vmem>>, vector<1x32xf32>
    %37 = vector.broadcast %36 : vector<1x32xf32> to vector<16x32xf32>
    %38 = arith.addf %35, %37 : vector<16x32xf32>
    %39 = arith.negf %38 : vector<16x32xf32>
    %40 = math.exp %39 : vector<16x32xf32>
    %cst_30 = arith.constant 1.000000e+00 : f32
    %41 = vector.broadcast %cst_30 : f32 to vector<16x32xf32>
    %42 = arith.addf %41, %40 : vector<16x32xf32>
    %43 = arith.divf %41, %42 : vector<16x32xf32>
    %c0_31 = arith.constant 0 : index
    %c0_32 = arith.constant 0 : index
    %44 = vector.load %arg13[%c0_31, %c0_32] : memref<16x32xf32, #tpu.memory_space<vmem>>, vector<16x32xf32>
    tpu.vector_store %arg13[%c0_31, %c0_32], %43 {strides = array<i32>} : memref<16x32xf32, #tpu.memory_space<vmem>>, vector<16x32xf32>,
    %c0_33 = arith.constant 0 : index
    %c0_34 = arith.constant 0 : index
    %45 = vector.load %arg14[%c0_33, %c0_34] : memref<16x16xf32, #tpu.memory_space<vmem>>, vector<16x16xf32>
    tpu.vector_store %arg14[%c0_33, %c0_34], %13 {strides = array<i32>} : memref<16x16xf32, #tpu.memory_space<vmem>>, vector<16x16xf32>,
    %c0_35 = arith.constant 0 : index
    %c0_36 = arith.constant 0 : index
    %46 = vector.load %arg15[%c0_35, %c0_36] : memref<16x16xf32, #tpu.memory_space<vmem>>, vector<16x16xf32>
    tpu.vector_store %arg15[%c0_35, %c0_36], %18 {strides = array<i32>} : memref<16x16xf32, #tpu.memory_space<vmem>>, vector<16x16xf32>,
    return
  }
  func.func @transform_0(%arg0: i32) -> (i32, i32) {
    %c0_i32 = arith.constant 0 : i32
    %c0_i32_0 = arith.constant 0 : i32
    return %arg0, %c0_i32 : i32, i32
  }
  func.func @transform_1(%arg0: i32) -> (i32, i32) {
    %c0_i32 = arith.constant 0 : i32
    %c0_i32_0 = arith.constant 0 : i32
    return %arg0, %c0_i32 : i32, i32
  }
  func.func @transform_2(%arg0: i32) -> (i32, i32) {
    %c0_i32 = arith.constant 0 : i32
    %c0_i32_0 = arith.constant 0 : i32
    %c0_i32_1 = arith.constant 0 : i32
    return %c0_i32, %c0_i32_0 : i32, i32
  }
  func.func @transform_3(%arg0: i32) -> (i32, i32) {
    %c0_i32 = arith.constant 0 : i32
    %c0_i32_0 = arith.constant 0 : i32
    %c0_i32_1 = arith.constant 0 : i32
    return %c0_i32, %c0_i32_0 : i32, i32
  }
  func.func @transform_4(%arg0: i32) -> (i32, i32) {
    %c0_i32 = arith.constant 0 : i32
    %c0_i32_0 = arith.constant 0 : i32
    %c0_i32_1 = arith.constant 0 : i32
    return %c0_i32, %c0_i32_0 : i32, i32
  }
  func.func @transform_5(%arg0: i32) -> (i32, i32) {
    %c0_i32 = arith.constant 0 : i32
    %c0_i32_0 = arith.constant 0 : i32
    %c0_i32_1 = arith.constant 0 : i32
    return %c0_i32, %c0_i32_0 : i32, i32
  }
  func.func @transform_6(%arg0: i32) -> (i32, i32) {
    %c0_i32 = arith.constant 0 : i32
    %c0_i32_0 = arith.constant 0 : i32
    %c0_i32_1 = arith.constant 0 : i32
    return %c0_i32, %c0_i32_0 : i32, i32
  }
  func.func @transform_7(%arg0: i32) -> (i32, i32) {
    %c0_i32 = arith.constant 0 : i32
    %c0_i32_0 = arith.constant 0 : i32
    %c0_i32_1 = arith.constant 0 : i32
    return %c0_i32, %c0_i32_0 : i32, i32
  }
  func.func @transform_8(%arg0: i32) -> (i32, i32) {
    %c0_i32 = arith.constant 0 : i32
    %c0_i32_0 = arith.constant 0 : i32
    %c0_i32_1 = arith.constant 0 : i32
    return %c0_i32, %c0_i32_0 : i32, i32
  }
  func.func @transform_9(%arg0: i32) -> (i32, i32) {
    %c0_i32 = arith.constant 0 : i32
    %c0_i32_0 = arith.constant 0 : i32
    %c0_i32_1 = arith.constant 0 : i32
    return %c0_i32, %c0_i32_0 : i32, i32
  }
  func.func @transform_10(%arg0: i32) -> (i32, i32) {
    %c0_i32 = arith.constant 0 : i32
    %c0_i32_0 = arith.constant 0 : i32
    %c0_i32_1 = arith.constant 0 : i32
    return %c0_i32, %c0_i32_0 : i32, i32
  }
  func.func @transform_11(%arg0: i32) -> (i32, i32) {
    %c0_i32 = arith.constant 0 : i32
    %c0_i32_0 = arith.constant 0 : i32
    %c0_i32_1 = arith.constant 0 : i32
    return %c0_i32, %c0_i32_0 : i32, i32
  }
  func.func @transform_12(%arg0: i32) -> (i32, i32) {
    %c0_i32 = arith.constant 0 : i32
    %c0_i32_0 = arith.constant 0 : i32
    return %arg0, %c0_i32 : i32, i32
  }
  func.func @transform_13(%arg0: i32) -> (i32, i32) {
    %c0_i32 = arith.constant 0 : i32
    %c0_i32_0 = arith.constant 0 : i32
    return %arg0, %c0_i32 : i32, i32
  }
  func.func @transform_14(%arg0: i32) -> (i32, i32) {
    %c0_i32 = arith.constant 0 : i32
    %c0_i32_0 = arith.constant 0 : i32
    return %arg0, %c0_i32 : i32, i32
  }
}

</mosaic_0001>

<bundles_post_ra>
// kernel: tpu_custom_call.1
= control target key start
LH: loop header
LB: loop body
LE: loop exit
PB: predicated region body
PF: predicated region fallthrough
CT: control target
= control target key end

     0   :  { %20 = vsyncpa [#allocation3], 0  ;;  %v716_v1 = vmov 0.0   ;;  %vm717_vm0 = vmmov 0   ;;  %vm77_vm1 = vcmask 261120   ;;  %s948_s0 = inlined_call_operand.vmem [shape: bf16[16,32], index: 0, kind: input, shape index: {}]   ;;  %s949_s1 = inlined_call_operand.vmem [shape: f32[16,16], index: 1, kind: input, shape index: {}]   ;;  %s950_s2 = inlined_call_operand.vmem [shape: bf16[32,64], index: 2, kind: input, shape index: {}]   ;;  %s951_s3 = inlined_call_operand.vmem [shape: f32[1,64], index: 3, kind: input, shape index: {}]   ;;  %s952_s4 = inlined_call_operand.vmem [shape: bf16[64,16], index: 4, kind: input, shape index: {}]   ;;  %s953_s5 = inlined_call_operand.vmem [shape: f32[1,16], index: 5, kind: input, shape index: {}]   ;;  %s954_s6 = inlined_call_operand.vmem [shape: bf16[64,16], index: 6, kind: input, shape index: {}]   ;;  %s955_s7 = inlined_call_operand.vmem [shape: f32[1,16], index: 7, kind: input, shape index: {}]   ;;  %s956_s8 = inlined_call_operand.vmem [shape: bf16[16,64], index: 8, kind: input, shape index: {}]   ;;  %s957_s9 = inlined_call_operand.vmem [shape: f32[1,64], index: 9, kind: input, shape index: {}]   ;;  %s958_s10 = inlined_call_operand.vmem [shape: bf16[64,32], index: 10, kind: input, shape index: {}]   ;;  %s959_s11 = inlined_call_operand.vmem [shape: f32[1,32], index: 11, kind: input, shape index: {}]   ;;  %s960_s12 = inlined_call_operand.hbm [shape: f32[16,32], index: 12, kind: output, shape index: {0}]   ;;  %s961_s13 = inlined_call_operand.hbm [shape: f32[16,16], index: 13, kind: output, shape index: {1}]   ;;  %s962_s14 = inlined_call_operand.hbm [shape: f32[16,16], index: 14, kind: output, shape index: {2}]  }
   0x1   :  { %v618_v0 = vld [vmem:[%s950_s2] sm:$0xff]   ;;  %561 = vmatprep.subr.bf16.mxu1 %v716_v1  ;;  %581 = vmatprep.subr.bf16.mxu0 %v716_v1  ;;  %v619_v2 = vld [vmem:[%s950_s2 + $0x8] sm:$0xff]  }
   0x2   :  { %562 = vmatpush3.bf16.msra.mxu1 %v618_v0  ;;  %565 = vmatprep.mubr.msk.bf16.mxu1 %vm717_vm0, %v716_v1  ;;  %v620_v3 = vld [vmem:[%s948_s0] sm:$0xff]   ;;  %v624_v6 = vld [vmem:[%s954_s6 + $0x8] sm:$0xff]  }
   0x3   :  { %563 = vmatprep.subr.bf16.mxu1 %v716_v1  ;;  %589 = vmatprep.mubr.msk.bf16.mxu0 %vm717_vm0, %v716_v1  ;;  %v622_v4 = vld [vmem:[%s954_s6] sm:$0xff]   ;;  %v623_v7 = vld [vmem:[%s952_s4 + $0x8] sm:$0xff]  }
   0x4   :  { %v621_v5 = vld [vmem:[%s952_s4] sm:$0xff]   ;;  %582 = vmatpush3.bf16.msra.mxu0 %v622_v4 }
   0x5   :  { %583 = vmatprep.subr.bf16.mxu0 %v716_v1 }
   0x6   :  { %564 = vmatpush3.bf16.msra.mxu1 %v619_v2 }
   0x7   :  { %569 = vmatprep.subr.bf16.mxu1 %v716_v1 }
   0x8   :  { %584 = vmatpush3.bf16.msra.mxu0 %v624_v6 }
   0x9   :  { %566 = vmatmul.mubr.msk.bf16.vlgmr.msra.gmra.mrb[0].mxu1 %vm77_vm1, %v620_v3  ;;  %585 = vmatprep.subr.bf16.mxu0 %v716_v1 }
   0xa   :  { %570 = vmatpush3.bf16.msra.mxu1 %v621_v5  ;;  %577 = vmatprep.mubr.msk.bf16.mxu1 %vm717_vm0, %v716_v1 }
   0xb   :  { %571 = vmatprep.subr.bf16.mxu1 %v716_v1 }
   0xc   :  { %21 = vsyncpa [#allocation5], 0  ;;  %v625_v8 = vld [vmem:[%s952_s4 + $0x10] sm:$0xff]   ;;  %v627_v10 = vld [vmem:[%s952_s4 + $0x18] sm:$0xff]   ;;  %vm164_vm2 = vcmask 523264   ;;  %vm317_vm3 = vcmask 130048  }
   0xd   :  { %v626_v9 = vld [vmem:[%s954_s6 + $0x10] sm:$0xff]   ;;  %v628_v11 = vld [vmem:[%s954_s6 + $0x18] sm:$0xff]   ;;  %v513_v12 = vld [vmem:[%s951_s3] ss:$0 sm:$0xff]  ;;  %s718_s30 = smov [#allocation4]  }
   0xe   :  { %572 = vmatpush3.bf16.msra.mxu1 %v623_v7  ;;  %586 = vmatpush3.bf16.msra.mxu0 %v626_v9  ;;  %v629_v22 = vld [vmem:[%s956_s8] sm:$0xff]   ;;  %v631_v24 = vld [vmem:[%s958_s10 + $0x8] sm:$0xff]   ;;  %v632_v52 = vld [vmem:[%s958_s10 + $0x10] sm:$0xff]   ;;  %s483_s15 = sshll.u32 %s718_s30, 4  ;;  %s484_s15 = int_to_ptr.vmem [resolvable:$true] %s483_s15 }
   0xf   :  { %573 = vmatprep.subr.bf16.mxu1 %v716_v1  ;;  %587 = vmatprep.subr.bf16.mxu0 %v716_v1  ;;  %v630_v23 = vld [vmem:[%s958_s10] sm:$0xff]   ;;  %v296_v45 = vld [vmem:[%s949_s1 + $0x8] sm:$0xff]  ;;  %v633_v53 = vld [vmem:[%s958_s10 + $0x18] sm:$0xff]   ;;  %s646_s10 = scalar_lea.vmem %s484_s15, 256  ;;  %p651_p1 = scmp.lt.s32.totalorder %s484_s15, %s484_s15 }
  0x10   :  { %v518_v25 = vld [vmem:[%s953_s5] ss:$0 sm:$0xff]  ;;  %p647_p0 = scmp.ne.s32.totalorder %s484_s15, %s646_s10  ;;  %p652_p2 = scmp.lt.s32.totalorder %s646_s10, %s646_s10 }
  0x11   :  { %v524_v26 = vld [vmem:[%s955_s7] ss:$0 sm:$0xff] }
  0x12   :  { %574 = vmatpush3.bf16.msra.mxu1 %v625_v8  ;;  %588 = vmatpush3.bf16.msra.mxu0 %v628_v11  ;;  %v295_v43 = vld [vmem:[%s949_s1] sm:$0xff]  ;;  %p653_p3 = por %p652_p2, %p651_p1 }
  0x13   :  { %575 = vmatprep.subr.bf16.mxu1 %v716_v1  ;;  %599 = vmatprep.subr.bf16.mxu0 %v716_v1  ;;  %v530_v54 = vld [vmem:[%s957_s9] ss:$0 sm:$0xff] }
  0x14   :  { %p654_p4 = pnand %p653_p3, %p647_p0 }
  0x16   :  { %576 = vmatpush3.bf16.msra.mxu1 %v627_v10 }
  0x17   :  { %593 = vmatprep.subr.bf16.mxu1 %v716_v1 }
  0xdc   :  { %v115_v13 = vpop.f32.mrb[0].mxu1 }
  0xdd   :  { %v116_v14 = vadd.f32 %v513_v12, %v115_v13  ;;  %v567_v15 = vpop.f32.mrb[1].mxu1 }
  0xde   :  { %v118_v16 = vpop.f32.mrb[2].mxu1 }
  0xdf   :  { %v119_v17 = vadd.f32 %v513_v12, %v118_v16  ;;  %v568_v18 = vpop.f32.mrb[3].mxu1  ;;  %v122_v19 = vmax.f32 %v116_v14, 0.0 }
  0xe1   :  { %v123_v20 = vmax.f32 %v119_v17, 0.0 }
  0xe3   :  { %v124_v21 = vpack.c.bf16 %v123_v20, %v122_v19 }
  0xe5   :  { %578 = vmatmul.mubr.msk.bf16.vlgmr.msra.gmra.mrb[4].mxu1 %vm164_vm2, %v124_v21  ;;  %590 = vmatmul.mubr.msk.bf16.vlgmr.msra.gmra.mrb[0].mxu0 %vm164_vm2, %v124_v21 }
  0xe6   :  { %595 = vmatprep.mubr.msk.bf16.mxu1 %vm717_vm0, %v716_v1  ;;  %607 = vmatprep.mubr.msk.bf16.mxu0 %vm717_vm0, %v716_v1 }
  0xe7   :  { %594 = vmatpush3.bf16.msra.mxu1 %v629_v22  ;;  %600 = vmatpush3.bf16.msra.mxu0 %v630_v23 }
  0xe8   :  { %601 = vmatprep.subr.bf16.mxu0 %v716_v1 }
  0xeb   :  { %602 = vmatpush3.bf16.msra.mxu0 %v631_v24 }
  0xec   :  { %603 = vmatprep.subr.bf16.mxu0 %v716_v1 }
  0xef   :  { %604 = vmatpush3.bf16.msra.mxu0 %v632_v52 }
  0xf0   :  { %605 = vmatprep.subr.bf16.mxu0 %v716_v1 }
  0xf3   :  { %606 = vmatpush3.bf16.msra.mxu0 %v633_v53 }
 0x1b8   :  { %v202_v27 = vpop.f32.mrb[4].mxu1  ;;  %v282_v28 = vpop.f32.mrb[0].mxu0 }
 0x1b9   :  { %v203_v29 = vadd.f32 %v518_v25, %v202_v27  ;;  %v283_v30 = vadd.f32 %v524_v26, %v282_v28  ;;  %v579_v31 = vpop.f32.mrb[5].mxu1  ;;  %v591_v32 = vpop.f32.mrb[1].mxu0 }
 0x1ba   :  { %v205_v33 = vpop.f32.mrb[6].mxu1  ;;  %v285_v34 = vpop.f32.mrb[2].mxu0 }
 0x1bb   :  { %462 = vst.msk [vmem:[#allocation4] sm:$0xff] %vm317_vm3, %v203_v29  ;;  %v289_v35 = vmul.f32 0.5, %v283_v30  ;;  %464 = vst.msk [vmem:[#allocation6] sm:$0xff] %vm317_vm3, %v283_v30  ;;  %v206_v36 = vadd.f32 %v518_v25, %v205_v33  ;;  %v286_v37 = vadd.f32 %v524_v26, %v285_v34  ;;  %v580_v38 = vpop.f32.mrb[7].mxu1  ;;  %v592_v39 = vpop.f32.mrb[3].mxu0 }
 0x1bd   :  { %v291_v40 = vmul.f32 1.442695, %v289_v35  ;;  %463 = vst.msk [vmem:[#allocation4 + $0x8] sm:$0xff] %vm317_vm3, %v206_v36  ;;  %v290_v41 = vmul.f32 0.5, %v286_v37  ;;  %465 = vst.msk [vmem:[#allocation6 + $0x8] sm:$0xff] %vm317_vm3, %v286_v37 }
 0x1bf   :  { %634 = vpow2.f32 %v291_v40  ;;  %v293_v42 = vmul.f32 1.442695, %v290_v41 }
 0x1c1   :  { %636 = vpow2.f32 %v293_v42 }
 0x1c9   :  { %v635_v44 = vpop.eup %634 }
 0x1ca   :  { %v297_v46 = vmul.f32 %v635_v44, %v295_v43 }
 0x1cb   :  { %v637_v47 = vpop.eup %636 }
 0x1cc   :  { %v298_v48 = vmul.f32 %v637_v47, %v296_v45  ;;  %v299_v49 = vadd.f32 %v297_v46, %v203_v29 }
 0x1ce   :  { %v300_v50 = vadd.f32 %v298_v48, %v206_v36 }
 0x1d0   :  { %v301_v51 = vpack.c.bf16 %v300_v50, %v299_v49 }
 0x1d2   :  { %596 = vmatmul.mubr.msk.bf16.vlgmr.msra.gmra.mrb[8].mxu1 %vm317_vm3, %v301_v51 }
 0x2a5   :  { %v355_v55 = vpop.f32.mrb[8].mxu1 }
 0x2a6   :  { %v356_v56 = vadd.f32 %v530_v54, %v355_v55  ;;  %v597_v57 = vpop.f32.mrb[9].mxu1 }
 0x2a7   :  { %v358_v58 = vpop.f32.mrb[10].mxu1 }
 0x2a8   :  { %v359_v59 = vadd.f32 %v530_v54, %v358_v58  ;;  %v598_v60 = vpop.f32.mrb[11].mxu1  ;;  %v362_v61 = vmax.f32 %v356_v56, 0.0 }
 0x2aa   :  { %v363_v62 = vmax.f32 %v359_v59, 0.0 }
 0x2ac   :  { %v364_v63 = vpack.c.bf16 %v363_v62, %v362_v61 }
 0x2ae   :  { %608 = vmatmul.mubr.msk.bf16.vlgmr.msra.gmra.mrb[4].mxu0 %vm164_vm2, %v364_v63 }
 0x2af   :  { %657 = shalt.err (!%p654_p4)
}
 0x2b0   :  { %s658_s17 = scalar_lea.hbm %s961_s13, 256 }
 0x2b1   :  { %p659_p5 = scmp.ne.s32.totalorder %s961_s13, %s658_s17  ;;  %p662_p6 = scmp.lt.u32.totalorder %s658_s17, %s961_s13 }
 0x2b3   :  { %p664_p7 = pnand %p662_p6, %p659_p5 }
 0x2b5   :  { %667 = shalt.err (!%p664_p7)
}
 0x2b6   :  { %s719_s19 = smov 128   ;;  %s720_s20 = smov 8  }
 0x2b7   :  { %489 = dma.vmem_to_hbm [thread:$0]  %s484_s15, 256, %s961_s13, [#allocation5], %s719_s19, %s719_s19, %s720_s20  }
 0x2b8   :  { %s721_s2 = smov [#allocation6]  }
 0x2b9   :  { %s495_s8 = sshll.u32 %s721_s2, 4  ;;  %s496_s8 = int_to_ptr.vmem [resolvable:$true] %s495_s8 }
 0x2ba   :  { %s668_s23 = scalar_lea.vmem %s496_s8, 256  ;;  %p673_p9 = scmp.lt.s32.totalorder %s496_s8, %s496_s8 }
 0x2bb   :  { %p669_p8 = scmp.ne.s32.totalorder %s496_s8, %s668_s23  ;;  %p674_p10 = scmp.lt.s32.totalorder %s668_s23, %s668_s23 }
 0x2bd   :  { %p675_p11 = por %p674_p10, %p673_p9 }
 0x2bf   :  { %p676_p12 = pnand %p675_p11, %p669_p8 }
 0x2c1   :  { %679 = shalt.err (!%p676_p12)
}
 0x2c2   :  { %s680_s0 = scalar_lea.hbm %s962_s14, 256 }
 0x2c3   :  { %p681_p13 = scmp.ne.s32.totalorder %s962_s14, %s680_s0  ;;  %p684_p0 = scmp.lt.u32.totalorder %s680_s0, %s962_s14 }
 0x2c5   :  { %p686_p1 = pnand %p684_p0, %p681_p13 }
 0x2c7   :  { %689 = shalt.err (!%p686_p1)
}
 0x2c8   :  { %501 = dma.vmem_to_hbm [thread:$0]  %s496_s8, 256, %s962_s14, [#allocation5], %s719_s19, %s719_s19, %s720_s20  }
 0x2c9   :  { %v533_v0 = vld [vmem:[%s959_s11] ss:$0 sm:$0xff]  ;;  %s722_s14 = smov [#allocation2]  }
 0x2ca   :  { %s471_s30 = sshll.u32 %s722_s14, 4  ;;  %s472_s30 = int_to_ptr.vmem [resolvable:$true] %s471_s30 }
 0x2cb   :  { %s690_s11 = scalar_lea.vmem %s472_s30, 256  ;;  %p695_p3 = scmp.lt.s32.totalorder %s472_s30, %s472_s30 }
 0x2cc   :  { %p691_p2 = scmp.ne.s32.totalorder %s472_s30, %s690_s11  ;;  %p696_p4 = scmp.lt.s32.totalorder %s690_s11, %s690_s11 }
 0x2ce   :  { %p697_p5 = por %p696_p4, %p695_p3 }
 0x2d0   :  { %p698_p6 = pnand %p697_p5, %p691_p2 }
 0x381   :  { %v441_v1 = vpop.f32.mrb[4].mxu0 }
 0x382   :  { %v442_v2 = vadd.f32 %v533_v0, %v441_v1  ;;  %v609_v3 = vpop.f32.mrb[5].mxu0 }
 0x383   :  { %v444_v4 = vpop.f32.mrb[6].mxu0 }
 0x384   :  { %v539_v5 = vmul.f32 -1.442695, %v442_v2  ;;  %v445_v6 = vadd.f32 %v533_v0, %v444_v4  ;;  %v610_v7 = vpop.f32.mrb[7].mxu0 }
 0x386   :  { %638 = vpow2.f32 %v539_v5  ;;  %v540_v8 = vmul.f32 -1.442695, %v445_v6 }
 0x388   :  { %640 = vpow2.f32 %v540_v8 }
 0x390   :  { %v639_v9 = vpop.eup %638 }
 0x391   :  { %v454_v10 = vadd.f32 1.0, %v639_v9 }
 0x392   :  { %v641_v11 = vpop.eup %640 }
 0x393   :  { %642 = vrcp.f32 %v454_v10  ;;  %v455_v12 = vadd.f32 1.0, %v641_v11 }
 0x395   :  { %644 = vrcp.f32 %v455_v12 }
 0x39d   :  { %v643_v13 = vpop.eup %642 }
 0x39e   :  { %460 = vst.msk [vmem:[#allocation2] sm:$0xff] %vm77_vm1, %v643_v13 }
 0x39f   :  { %v645_v14 = vpop.eup %644 }
 0x3a0   :  { %461 = vst.msk [vmem:[#allocation2 + $0x8] sm:$0xff] %vm77_vm1, %v645_v14 }
 0x3a1   :  { %701 = shalt.err (!%p698_p6)
}
 0x3a2   :  { %s702_s9 = scalar_lea.hbm %s960_s12, 256 }
 0x3a3   :  { %p703_p7 = scmp.ne.s32.totalorder %s960_s12, %s702_s9  ;;  %p706_p8 = scmp.lt.u32.totalorder %s702_s9, %s960_s12 }
 0x3a5   :  { %p708_p9 = pnand %p706_p8, %p703_p7 }
 0x3a7   :  { %711 = shalt.err (!%p708_p9)
}
 0x3a8   :  { %477 = dma.vmem_to_hbm [thread:$0]  %s472_s30, 256, %s960_s12, [#allocation3], %s719_s19, %s719_s19, %s720_s20  }
 0x3a9   :  { %712 = dma.done.wait [#allocation3], 256  }
 0x3aa   :  { %713 = vsyncadd [#allocation3], 4294967040 }
 0x3ab   :  { %714 = dma.done.wait [#allocation5], 512  }
 0x3ac   :  { %715 = vsyncadd [#allocation5], 4294966784 }
 0x3ad   :  { %511 = vsyncpa [#allocation3], 1 }
 0x3ae   :  { %512 = vsyncpa [#allocation5], 1 }

</bundles_post_ra>
